<compile_context>
chip_gen: v7x
topology: tpu7x:2x2x1
jax: 0.10.0
libtpu: 0.0.40
codegen_flags: <defaults>
</compile_context>

<pallas_src>
import jax
import jax.numpy as jnp
from jax.experimental import pallas as pl
from jax.experimental.pallas import tpu as pltpu


# ----------------------------------------------------------------------------
# Fused kernel: both branches in one step.
#   a_ref  : (2N, 2N) block-diagonal, pre-normalized D^-1/2 (A+I) D^-1/2
#   fa/fb  : (N, F) features,  ha/hb : (N, F) hidden states
#   wt_ref : (F, F) GCN weight, pre-transposed to (in, out)
#   b_ref  : (1, F) bias
#   oa/ob  : (N, F) outputs  (LeakyReLU(GCNConv(...)))
# ----------------------------------------------------------------------------
def fused_rnn_kernel(a_ref, fa_ref, fb_ref, ha_ref, hb_ref, wt_ref, b_ref,
                     oa_ref, ob_ref):
    n = fa_ref.shape[0]

    # X for both graphs, concatenated along the node (sublane) axis -> (2N, F).
    x = jnp.concatenate(
        [fa_ref[...] + 0.8 * ha_ref[...],
         fb_ref[...] + 0.8 * hb_ref[...]], axis=0)

    # Shared linear transform: one MXU pass at M = 2N (f32 operands, f32 acc).
    hlin = jnp.dot(x, wt_ref[...], preferred_element_type=jnp.float32)

    # Symmetric-normalized aggregation for both graphs at once
    # (block-diagonal adjacency -> graphs stay independent).
    agg = jnp.dot(a_ref[...], hlin, preferred_element_type=jnp.float32)

    y = agg + b_ref[...]                       # bias added after aggregation (PyG)
    y = jnp.where(y >= 0.0, y, 0.01 * y)       # LeakyReLU(negative_slope=0.01)

    oa_ref[...] = y[:n]
    ob_ref[...] = y[n:]


# ----------------------------------------------------------------------------
# Once-per-graph preprocessing (hoisted out of the kernel): dense adjacency
# (A[dst, src] = 1 per edge) -> normalized block-diagonal GCN propagation matrix.
# ----------------------------------------------------------------------------
def precompute_gcn_block_adjacency(a1, a2):
    def norm(a):
        n = a.shape[0]
        a_hat = a + jnp.eye(n, dtype=a.dtype)              # add self loops
        deg = jnp.sum(a_hat, axis=1, keepdims=True)        # in-degree + 1  (>= 1)
        dinv = jax.lax.rsqrt(deg)
        return dinv * a_hat * dinv.T                       # D^-1/2 A_hat D^-1/2

    n1, n2 = norm(a1), norm(a2)
    z = jnp.zeros((a1.shape[0], a2.shape[0]), a1.dtype)
    top = jnp.concatenate([n1, z], axis=1)
    bot = jnp.concatenate([z.T, n2], axis=1)
    return jnp.concatenate([top, bot], axis=0)             # (2N, 2N)


# ----------------------------------------------------------------------------
# Single-jit wrapper: one pallas_call for the whole forward.
# ----------------------------------------------------------------------------
@jax.jit
def rnn_forward(a_norm_bd, feature_a, feature_b, hidden_a, hidden_b, wt, b):
    n, f = feature_a.shape
    b2d = b.reshape(1, f)

    flops = 2 * (2 * n) * f * f + 2 * (2 * n) * (2 * n) * f + 6 * (2 * n) * f
    bytes_accessed = 4 * (a_norm_bd.size + 4 * n * f + wt.size + b2d.size + 2 * n * f)

    vmem_spec = pl.BlockSpec(memory_space=pltpu.MemorySpace.VMEM)

    fa_out, fb_out = pl.pallas_call(
        fused_rnn_kernel,
        out_shape=(jax.ShapeDtypeStruct((n, f), jnp.float32),
                   jax.ShapeDtypeStruct((n, f), jnp.float32)),
        in_specs=[vmem_spec] * 7,
        out_specs=(vmem_spec, vmem_spec),
        cost_estimate=pl.CostEstimate(flops=int(flops), transcendentals=0,
                                      bytes_accessed=int(bytes_accessed)),
    )(a_norm_bd, feature_a, feature_b, hidden_a, hidden_b, wt, b2d)

    # hidden_A / hidden_B are returned unchanged by the module.
    return fa_out, fb_out, hidden_a, hidden_b


# ----------------------------------------------------------------------------
# Pure-JAX (f32, highest precision) reference mirroring PyG GCNConv + LeakyReLU.
# ----------------------------------------------------------------------------
def rnn_reference(a1, a2, feature_a, feature_b, hidden_a, hidden_b, wt, b):
    def gcn(a, x):
        n = a.shape[0]
        a_hat = a + jnp.eye(n, dtype=jnp.float32)
        deg = jnp.sum(a_hat, axis=1, keepdims=True)
        dinv = 1.0 / jnp.sqrt(deg)
        a_norm = dinv * a_hat * dinv.T
        h = jnp.matmul(x, wt, precision="highest")
        return jnp.matmul(a_norm, h, precision="highest") + b

    def lrelu(v):
        return jnp.where(v >= 0.0, v, 0.01 * v)

    fa = lrelu(gcn(a1, feature_a + 0.8 * hidden_a))
    fb = lrelu(gcn(a2, feature_b + 0.8 * hidden_b))
    return fa, fb, hidden_a, hidden_b


if __name__ == "__main__":
    NODE_SUM = 128   # in/out feature dim of GCNConv (batch_size = 1) -> lane-dense
    N_NODES = 16     # nodes per graph

    key = jax.random.PRNGKey(0)
    ks = jax.random.split(key, 8)

    feature_a = jax.random.normal(ks[0], (N_NODES, NODE_SUM), jnp.float32)
    feature_b = jax.random.normal(ks[1], (N_NODES, NODE_SUM), jnp.float32)
    hidden_a = jax.random.normal(ks[2], (N_NODES, NODE_SUM), jnp.float32)
    hidden_b = jax.random.normal(ks[3], (N_NODES, NODE_SUM), jnp.float32)

    # Dense adjacency from edge_index: A[dst, src] = 1 per edge, no explicit
    # self loops (GCNConv adds them).  Undirected (symmetric) random graphs.
    def rand_adj(k):
        m = (jax.random.uniform(k, (N_NODES, N_NODES)) < 0.3).astype(jnp.float32)
        m = jnp.maximum(m, m.T)
        return m * (1.0 - jnp.eye(N_NODES, dtype=jnp.float32))

    a1 = rand_adj(ks[4])
    a2 = rand_adj(ks[5])

    # GCNConv parameters, stored pre-transposed: wt = W.T with shape (in, out).
    bound = 1.0 / jnp.sqrt(jnp.float32(NODE_SUM))
    wt = jax.random.uniform(ks[6], (NODE_SUM, NODE_SUM), jnp.float32, -bound, bound)
    b = jax.random.uniform(ks[7], (NODE_SUM,), jnp.float32, -bound, bound)

    # Adjacency normalization hoisted out of the per-step kernel (reusable
    # across RNN timesteps when the graph topology is static).
    a_norm_bd = precompute_gcn_block_adjacency(a1, a2)

    fa, fb, ha, hb = rnn_forward(a_norm_bd, feature_a, feature_b,
                                 hidden_a, hidden_b, wt, b)
    (fa, fb, ha, hb) = jax.block_until_ready((fa, fb, ha, hb))

    rfa, rfb, _, _ = rnn_reference(a1, a2, feature_a, feature_b,
                                   hidden_a, hidden_b, wt, b)

    assert fa.shape == (N_NODES, NODE_SUM) and fb.shape == (N_NODES, NODE_SUM)
    assert jnp.allclose(fa, rfa, rtol=2e-2, atol=2e-2), "FA mismatch vs reference"
    assert jnp.allclose(fb, rfb, rtol=2e-2, atol=2e-2), "FB mismatch vs reference"
    assert bool((ha == hidden_a).all()) and bool((hb == hidden_b).all())

    print("KERNEL_OK")
</pallas_src>

<mosaic_0001>
module attributes {stable_mosaic.version = 11 : i64} {
  func.func @fused_rnn_kernel(%arg0: memref<32x32xf32, #tpu.memory_space<vmem>>, %arg1: memref<16x128xf32, #tpu.memory_space<vmem>>, %arg2: memref<16x128xf32, #tpu.memory_space<vmem>>, %arg3: memref<16x128xf32, #tpu.memory_space<vmem>>, %arg4: memref<16x128xf32, #tpu.memory_space<vmem>>, %arg5: memref<128x128xf32, #tpu.memory_space<vmem>>, %arg6: memref<1x128xf32, #tpu.memory_space<vmem>>, %arg7: memref<16x128xf32, #tpu.memory_space<vmem>>, %arg8: memref<16x128xf32, #tpu.memory_space<vmem>>) attributes {dimension_semantics = [], scalar_prefetch = 0 : i64, scratch_operands = 0 : i64, tpu.core_type = #tpu.core_type<tc>} {
    %c0 = arith.constant 0 : index
    %c0_0 = arith.constant 0 : index
    %0 = vector.load %arg1[%c0, %c0_0] : memref<16x128xf32, #tpu.memory_space<vmem>>, vector<16x128xf32>
    %c0_1 = arith.constant 0 : index
    %c0_2 = arith.constant 0 : index
    %1 = vector.load %arg3[%c0_1, %c0_2] : memref<16x128xf32, #tpu.memory_space<vmem>>, vector<16x128xf32>
    %cst = arith.constant 8.000000e-01 : f32
    %2 = vector.broadcast %cst : f32 to vector<16x128xf32>
    %3 = arith.mulf %2, %1 : vector<16x128xf32>
    %4 = arith.addf %0, %3 : vector<16x128xf32>
    %c0_3 = arith.constant 0 : index
    %c0_4 = arith.constant 0 : index
    %5 = vector.load %arg2[%c0_3, %c0_4] : memref<16x128xf32, #tpu.memory_space<vmem>>, vector<16x128xf32>
    %c0_5 = arith.constant 0 : index
    %c0_6 = arith.constant 0 : index
    %6 = vector.load %arg4[%c0_5, %c0_6] : memref<16x128xf32, #tpu.memory_space<vmem>>, vector<16x128xf32>
    %cst_7 = arith.constant 8.000000e-01 : f32
    %7 = vector.broadcast %cst_7 : f32 to vector<16x128xf32>
    %8 = arith.mulf %7, %6 : vector<16x128xf32>
    %9 = arith.addf %5, %8 : vector<16x128xf32>
    %10 = tpu.concatenate %4, %9 in 0 : vector<16x128xf32>, vector<16x128xf32> -> vector<32x128xf32>
    %c0_8 = arith.constant 0 : index
    %c0_9 = arith.constant 0 : index
    %11 = vector.load %arg5[%c0_8, %c0_9] : memref<128x128xf32, #tpu.memory_space<vmem>>, vector<128x128xf32>
    %cst_10 = arith.constant dense<0.000000e+00> : vector<32x128xf32>
    %12 = tpu.matmul %10, %11, %cst_10 {dimension_numbers = #tpu.dot_dimension_numbers<[1], [0], [0], [1], [0, 0, 1, 1], [], []>} : vector<32x128xf32>, vector<128x128xf32>, vector<32x128xf32> -> vector<32x128xf32>
    %c0_11 = arith.constant 0 : index
    %c0_12 = arith.constant 0 : index
    %13 = vector.load %arg0[%c0_11, %c0_12] : memref<32x32xf32, #tpu.memory_space<vmem>>, vector<32x32xf32>
    %cst_13 = arith.constant dense<0.000000e+00> : vector<32x128xf32>
    %14 = tpu.matmul %13, %12, %cst_13 {dimension_numbers = #tpu.dot_dimension_numbers<[1], [0], [0], [1], [0, 0, 1, 1], [], []>} : vector<32x32xf32>, vector<32x128xf32>, vector<32x128xf32> -> vector<32x128xf32>
    %c0_14 = arith.constant 0 : index
    %c0_15 = arith.constant 0 : index
    %15 = vector.load %arg6[%c0_14, %c0_15] : memref<1x128xf32, #tpu.memory_space<vmem>>, vector<1x128xf32>
    %16 = vector.broadcast %15 : vector<1x128xf32> to vector<32x128xf32>
    %17 = arith.addf %14, %16 : vector<32x128xf32>
    %cst_16 = arith.constant 0.000000e+00 : f32
    %18 = vector.broadcast %cst_16 : f32 to vector<32x128xf32>
    %19 = arith.cmpf oge, %17, %18 : vector<32x128xf32>
    %cst_17 = arith.constant 0.00999999977 : f32
    %20 = vector.broadcast %cst_17 : f32 to vector<32x128xf32>
    %21 = arith.mulf %20, %17 : vector<32x128xf32>
    %22 = arith.select %19, %17, %21 : vector<32x128xi1>, vector<32x128xf32>
    %23 = vector.extract_strided_slice %22 {offsets = [0, 0], sizes = [16, 128], strides = [1, 1]} : vector<32x128xf32> to vector<16x128xf32>
    %c0_18 = arith.constant 0 : index
    %c0_19 = arith.constant 0 : index
    %24 = vector.load %arg7[%c0_18, %c0_19] : memref<16x128xf32, #tpu.memory_space<vmem>>, vector<16x128xf32>
    tpu.vector_store %arg7[%c0_18, %c0_19], %23 {strides = array<i32>} : memref<16x128xf32, #tpu.memory_space<vmem>>, vector<16x128xf32>,
    %25 = vector.extract_strided_slice %22 {offsets = [16, 0], sizes = [16, 128], strides = [1, 1]} : vector<32x128xf32> to vector<16x128xf32>
    %c0_20 = arith.constant 0 : index
    %c0_21 = arith.constant 0 : index
    %26 = vector.load %arg8[%c0_20, %c0_21] : memref<16x128xf32, #tpu.memory_space<vmem>>, vector<16x128xf32>
    tpu.vector_store %arg8[%c0_20, %c0_21], %25 {strides = array<i32>} : memref<16x128xf32, #tpu.memory_space<vmem>>, vector<16x128xf32>,
    return
  }
}

</mosaic_0001>

<bundles_post_ra>
// kernel: rnn_forward.1
= control target key start
LH: loop header
LB: loop body
LE: loop exit
PB: predicated region body
PF: predicated region fallthrough
CT: control target
= control target key end

     0   :  { %14 = vsyncpa [#allocation3], 0  ;;  %s861_s0 = inlined_call_operand.hbm [shape: f32[32,32], index: 0, kind: input, shape index: {}]   ;;  %s862_s1 = inlined_call_operand.hbm [shape: f32[16,128], index: 1, kind: input, shape index: {}]   ;;  %s863_s2 = inlined_call_operand.hbm [shape: f32[16,128], index: 2, kind: input, shape index: {}]   ;;  %s864_s3 = inlined_call_operand.vmem [shape: f32[16,128], index: 3, kind: input, shape index: {}]   ;;  %s865_s4 = inlined_call_operand.hbm [shape: f32[16,128], index: 4, kind: input, shape index: {}]   ;;  %s866_s5 = inlined_call_operand.hbm [shape: f32[128,128], index: 5, kind: input, shape index: {}]   ;;  %s867_s6 = inlined_call_operand.vmem [shape: f32[1,128], index: 6, kind: input, shape index: {}]   ;;  %s868_s7 = inlined_call_operand.hbm [shape: f32[16,128], index: 7, kind: output, shape index: {0}]   ;;  %s869_s8 = inlined_call_operand.hbm [shape: f32[16,128], index: 8, kind: output, shape index: {1}]  }
   0x1   :  { %15 = vsyncpa [#allocation6], 0 }
   0x2   :  { %16 = vsyncpa [#allocation9], 0 }
   0x3   :  { %17 = vsyncpa [#allocation4], 0 }
   0x4   :  { %18 = vsyncpa [#allocation13], 0  ;;  %s673_s27 = smov [#allocation5]   ;;  %s674_s29 = smov [#allocation8]  }
   0x5   :  { %s36_s28 = sshll.u32 %s673_s27, 4  ;;  %s62_s30 = sshll.u32 %s674_s29, 4  ;;  %s37_s28 = int_to_ptr.vmem [resolvable:$true] %s36_s28  ;;  %s727_s30 = int_to_ptr.vmem [resolvable:$true] %s62_s30 }
   0x6   :  { %s509_s11 = scalar_lea.hbm %s862_s1, 256 }
   0x7   :  { %p510_p0 = scmp.ne.s32.totalorder %s862_s1, %s509_s11  ;;  %p513_p1 = scmp.lt.u32.totalorder %s509_s11, %s862_s1 }
   0x9   :  { %p515_p2 = pnand %p513_p1, %p510_p0 }
   0xb   :  { %518 = shalt.err (!%p515_p2)
}
   0xc   :  { %s519_s16 = scalar_lea.vmem %s37_s28, 256  ;;  %p524_p4 = scmp.lt.s32.totalorder %s37_s28, %s37_s28 }
   0xd   :  { %p520_p3 = scmp.ne.s32.totalorder %s37_s28, %s519_s16  ;;  %p525_p5 = scmp.lt.s32.totalorder %s519_s16, %s519_s16 }
   0xf   :  { %p526_p6 = por %p525_p5, %p524_p4 }
  0x11   :  { %p527_p7 = pnand %p526_p6, %p520_p3 }
  0x13   :  { %530 = shalt.err (!%p527_p7)
}
  0x14   :  { %s675_s17 = smov 128   ;;  %s676_s18 = smov 8  }
  0x15   :  { %42 = dma.hbm_to_vmem [thread:$0]  %s862_s1, 256, %s37_s28, [#allocation6], %s675_s17, %s675_s17, %s676_s18  }
  0x16   :  { %s531_s23 = scalar_lea.hbm %s865_s4, 256 }
  0x17   :  { %p532_p8 = scmp.ne.s32.totalorder %s865_s4, %s531_s23  ;;  %p535_p9 = scmp.lt.u32.totalorder %s531_s23, %s865_s4 }
  0x19   :  { %p537_p10 = pnand %p535_p9, %p532_p8 }
  0x1b   :  { %540 = shalt.err (!%p537_p10)
}
  0x1c   :  { %s541_s29 = scalar_lea.vmem %s727_s30, 256  ;;  %p546_p12 = scmp.lt.s32.totalorder %s727_s30, %s727_s30 }
  0x1d   :  { %p542_p11 = scmp.ne.s32.totalorder %s727_s30, %s541_s29  ;;  %p547_p13 = scmp.lt.s32.totalorder %s541_s29, %s541_s29 }
  0x1f   :  { %p548_p0 = por %p547_p13, %p546_p12 }
  0x21   :  { %p549_p1 = pnand %p548_p0, %p542_p11 }
  0x23   :  { %552 = shalt.err (!%p549_p1)
}
  0x24   :  { %68 = dma.hbm_to_vmem [thread:$0]  %s865_s4, 256, %s727_s30, [#allocation9], %s675_s17, %s675_s17, %s676_s18  }
  0x25   :  { %s677_s9 = smov [#allocation2]   ;;  %s678_s11 = smov [#allocation7]  }
  0x26   :  { %s24_s10 = sshll.u32 %s677_s9, 4  ;;  %s48_s12 = sshll.u32 %s678_s11, 4  ;;  %s25_s10 = int_to_ptr.vmem [resolvable:$true] %s24_s10  ;;  %s764_s12 = int_to_ptr.vmem [resolvable:$true] %s48_s12 }
  0x27   :  { %s553_s15 = scalar_lea.hbm %s861_s0, 512 }
  0x28   :  { %p554_p2 = scmp.ne.s32.totalorder %s861_s0, %s553_s15  ;;  %p557_p3 = scmp.lt.u32.totalorder %s553_s15, %s861_s0 }
  0x2a   :  { %p559_p4 = pnand %p557_p3, %p554_p2 }
  0x2c   :  { %562 = shalt.err (!%p559_p4)
}
  0x2d   :  { %s563_s4 = scalar_lea.vmem %s25_s10, 512  ;;  %p568_p6 = scmp.lt.s32.totalorder %s25_s10, %s25_s10 }
  0x2e   :  { %p564_p5 = scmp.ne.s32.totalorder %s25_s10, %s563_s4  ;;  %p569_p7 = scmp.lt.s32.totalorder %s563_s4, %s563_s4 }
  0x30   :  { %p570_p8 = por %p569_p7, %p568_p6 }
  0x32   :  { %p571_p9 = pnand %p570_p8, %p564_p5 }
  0x34   :  { %574 = shalt.err (!%p571_p9)
}
  0x35   :  { %30 = dma.hbm_to_vmem [thread:$0]  %s861_s0, 512, %s25_s10, [#allocation3], %s675_s17, %s675_s17, %s676_s18  }
  0x36   :  { %s575_s25 = scalar_lea.hbm %s863_s2, 256 }
  0x37   :  { %p576_p10 = scmp.ne.s32.totalorder %s863_s2, %s575_s25  ;;  %p579_p11 = scmp.lt.u32.totalorder %s575_s25, %s863_s2 }
  0x39   :  { %p581_p12 = pnand %p579_p11, %p576_p10 }
  0x3b   :  { %584 = shalt.err (!%p581_p12)
}
  0x3c   :  { %s585_s28 = scalar_lea.vmem %s764_s12, 256  ;;  %p590_p0 = scmp.lt.s32.totalorder %s764_s12, %s764_s12 }
  0x3d   :  { %p586_p13 = scmp.ne.s32.totalorder %s764_s12, %s585_s28  ;;  %p591_p1 = scmp.lt.s32.totalorder %s585_s28, %s585_s28 }
  0x3f   :  { %p592_p2 = por %p591_p1, %p590_p0 }
  0x41   :  { %p593_p3 = pnand %p592_p2, %p586_p13 }
  0x43   :  { %596 = shalt.err (!%p593_p3)
}
  0x44   :  { %54 = dma.hbm_to_vmem [thread:$0]  %s863_s2, 256, %s764_s12, [#allocation6], %s675_s17, %s675_s17, %s676_s18  }
  0x45   :  { %s679_s10 = smov [#allocation10]   ;;  %s597_s15 = scalar_lea.hbm %s866_s5, 2048 }
  0x46   :  { %s74_s11 = sshll.u32 %s679_s10, 4  ;;  %p598_p4 = scmp.ne.s32.totalorder %s866_s5, %s597_s15  ;;  %s75_s11 = int_to_ptr.vmem [resolvable:$true] %s74_s11 }
  0x47   :  { %p601_p5 = scmp.lt.u32.totalorder %s597_s15, %s866_s5 }
  0x49   :  { %p603_p6 = pnand %p601_p5, %p598_p4 }
  0x4b   :  { %606 = shalt.err (!%p603_p6)
}
  0x4c   :  { %s607_s4 = scalar_lea.vmem %s75_s11, 2048  ;;  %p612_p8 = scmp.lt.s32.totalorder %s75_s11, %s75_s11 }
  0x4d   :  { %p608_p7 = scmp.ne.s32.totalorder %s75_s11, %s607_s4  ;;  %p613_p9 = scmp.lt.s32.totalorder %s607_s4, %s607_s4 }
  0x4f   :  { %p614_p10 = por %p613_p9, %p612_p8 }
  0x51   :  { %p615_p11 = pnand %p614_p10, %p608_p7 }
  0x53   :  { %618 = shalt.err (!%p615_p11)
}
  0x54   :  { %80 = dma.hbm_to_vmem [thread:$0]  %s866_s5, 2048, %s75_s11, [#allocation9], %s675_s17, %s675_s17, %s676_s18  }
  0x55   :  { %663 = dma.done.wait [#allocation3], 512  }
  0x56   :  { %664 = vsyncadd [#allocation3], 4294966784 }
  0x57   :  { %665 = dma.done.wait [#allocation6], 512  }
  0x58   :  { %666 = vsyncadd [#allocation6], 4294966784 }
  0x59   :  { %667 = dma.done.wait [#allocation9], 2304  }
  0x5a   :  { %668 = vsyncadd [#allocation9], 4294964992  ;;  %v114_v0 = vld [vmem:[#allocation10] sm:$0xff]  ;;  %v115_v1 = vld [vmem:[#allocation10 + $0x8] sm:$0xff]  ;;  %vm226_vm0 = vcmask 261120   ;;  %s680_s25 = smov [#allocation11]  }
  0x5b   :  { %v116_v2 = vld [vmem:[#allocation10 + $0x10] sm:$0xff]  ;;  %v460_v3 = vpack.c.bf16 %v115_v1, %v114_v0  ;;  %v117_v4 = vld [vmem:[#allocation10 + $0x18] sm:$0xff]  ;;  %v118_v6 = vld [vmem:[#allocation10 + $0x20] sm:$0xff]  ;;  %s345_s26 = sshll.u32 %s680_s25, 4  ;;  %s681_s27 = smov [#allocation12]   ;;  %s346_s26 = int_to_ptr.vmem [resolvable:$true] %s345_s26 }
  0x5c   :  { %v464_v5 = vpack.c.bf16 %v117_v4, %v116_v2  ;;  %v119_v7 = vld [vmem:[#allocation10 + $0x28] sm:$0xff]  ;;  %v98_v9 = vld [vmem:[#allocation5] sm:$0xff]  ;;  %v121_v12 = vld [vmem:[#allocation10 + $0x38] sm:$0xff]  ;;  %s619_s29 = scalar_lea.vmem %s346_s26, 256  ;;  %p624_p13 = scmp.lt.s32.totalorder %s346_s26, %s346_s26 }
  0x5d   :  { %461 = vmatprep.subr.bf16.mxu0 %v460_v3  ;;  %v468_v8 = vpack.c.bf16 %v119_v7, %v118_v6  ;;  %v100_v10 = vld [vmem:[%s864_s3] sm:$0xff]  ;;  %v122_v16 = vld [vmem:[#allocation10 + $0x40] sm:$0xff]  ;;  %v123_v17 = vld [vmem:[#allocation10 + $0x48] sm:$0xff]  ;;  %p620_p12 = scmp.ne.s32.totalorder %s346_s26, %s619_s29  ;;  %p625_p0 = scmp.lt.s32.totalorder %s619_s29, %s619_s29 }
  0x5e   :  { %463 = vmatpush3.bf16.msra.mxu0 %v460_v3  ;;  %v120_v11 = vld [vmem:[#allocation10 + $0x30] sm:$0xff]  ;;  %v102_v13 = vmul.f32 0.8, %v100_v10  ;;  %v476_v18 = vpack.c.bf16 %v123_v17, %v122_v16  ;;  %v125_v20 = vld [vmem:[#allocation10 + $0x58] sm:$0xff]  ;;  %v126_v22 = vld [vmem:[#allocation10 + $0x60] sm:$0xff] }
  0x5f   :  { %465 = vmatprep.subr.bf16.mxu0 %v464_v5  ;;  %v472_v15 = vpack.c.bf16 %v121_v12, %v120_v11  ;;  %v124_v19 = vld [vmem:[#allocation10 + $0x50] sm:$0xff]  ;;  %v127_v23 = vld [vmem:[#allocation10 + $0x68] sm:$0xff]  ;;  %v129_v26 = vld [vmem:[#allocation10 + $0x78] sm:$0xff]  ;;  %p626_p1 = por %p625_p0, %p624_p13 }
  0x60   :  { %v104_v14 = vadd.f32 %v102_v13, %v98_v9  ;;  %v480_v21 = vpack.c.bf16 %v125_v20, %v124_v19  ;;  %v484_v24 = vpack.c.bf16 %v127_v23, %v126_v22  ;;  %v128_v25 = vld [vmem:[#allocation10 + $0x70] sm:$0xff]  ;;  %v101_v27 = vld [vmem:[%s864_s3 + $0x8] sm:$0xff]  ;;  %v106_v34 = vld [vmem:[#allocation7] sm:$0xff] }
  0x61   :  { %v488_v28 = vpack.c.bf16 %v129_v26, %v128_v25  ;;  %v108_v29 = vld [vmem:[#allocation8] sm:$0xff]  ;;  %v103_v30 = vmul.f32 0.8, %v101_v27  ;;  %v99_v31 = vld [vmem:[#allocation5 + $0x8] sm:$0xff]  ;;  %v107_v38 = vld [vmem:[#allocation7 + $0x8] sm:$0xff]  ;;  %p627_p2 = pnand %p626_p1, %p620_p12 }
  0x62   :  { %467 = vmatpush3.bf16.msra.mxu0 %v464_v5  ;;  %440 = vmatprep.mubr.f32.mxu0 %v104_v14  ;;  %v110_v32 = vmul.f32 0.8, %v108_v29  ;;  %v109_v33 = vld [vmem:[#allocation8 + $0x8] sm:$0xff]  ;;  %v215_v40 = vld [vmem:[#allocation2] sm:$0xff]  ;;  %v217_v48 = vld [vmem:[#allocation2 + $0x10] sm:$0xff] }
  0x63   :  { %469 = vmatprep.subr.bf16.mxu0 %v468_v8  ;;  %v105_v35 = vadd.f32 %v103_v30, %v99_v31  ;;  %v111_v36 = vmul.f32 0.8, %v109_v33  ;;  %454 = vmatprep.mubr.msk.f32.mxu1 %vm226_vm0, %v215_v40  ;;  %v216_v47 = vld [vmem:[#allocation2 + $0x8] sm:$0xff]  ;;  %v218_v49 = vld [vmem:[#allocation2 + $0x18] sm:$0xff]  ;;  %v375_v50 = vld [vmem:[%s867_s6] ss:$0 sm:$0xff] }
  0x64   :  { %v112_v37 = vadd.f32 %v110_v32, %v106_v34  ;;  %s357_s6 = sshll.u32 %s681_s27, 4  ;;  %s358_s6 = int_to_ptr.vmem [resolvable:$true] %s357_s6 }
  0x65   :  { %v113_v39 = vadd.f32 %v111_v36, %v107_v38 }
  0x66   :  { %471 = vmatpush3.bf16.msra.mxu0 %v468_v8 }
  0x67   :  { %473 = vmatprep.subr.bf16.mxu0 %v472_v15 }
  0x6a   :  { %475 = vmatpush3.bf16.msra.mxu0 %v472_v15 }
  0x6b   :  { %477 = vmatprep.subr.bf16.mxu0 %v476_v18 }
  0x6e   :  { %479 = vmatpush3.bf16.msra.mxu0 %v476_v18 }
  0x6f   :  { %481 = vmatprep.subr.bf16.mxu0 %v480_v21 }
  0x72   :  { %483 = vmatpush3.bf16.msra.mxu0 %v480_v21 }
  0x73   :  { %485 = vmatprep.subr.bf16.mxu0 %v484_v24 }
  0x76   :  { %487 = vmatpush3.bf16.msra.mxu0 %v484_v24 }
  0x77   :  { %489 = vmatprep.subr.bf16.mxu0 %v488_v28 }
  0x7a   :  { %491 = vmatpush3.bf16.msra.mxu0 %v488_v28 }
  0x7d   :  { %441 = vmatmul.mubr.f32.vlgmr.msra.gmra.mrb[0].mxu0 %v105_v35 }
  0x7e   :  { %443 = vmatprep.mubr.f32.mxu0 %v112_v37 }
  0x81   :  { %444 = vmatmul.mubr.f32.gmra.mrb[2].mxu0 %v113_v39 }
 0x150   :  { %v442_v41 = vpop.f32.mrb[0].mxu0 }
 0x151   :  { %v196_v42 = vpop.f32.mrb[1].mxu0 }
 0x152   :  { %v492_v43 = vpack.c.bf16 %v442_v41, %v196_v42 }
 0x154   :  { %v445_v44 = vpop.f32.mrb[2].mxu0  ;;  %493 = vmatprep.subr.bf16.mxu1 %v492_v43 }
 0x155   :  { %v206_v45 = vpop.f32.mrb[3].mxu0  ;;  %495 = vmatpush3.bf16.msra.mxu1 %v492_v43 }
 0x156   :  { %v496_v46 = vpack.c.bf16 %v445_v44, %v206_v45 }
 0x158   :  { %497 = vmatprep.subr.bf16.mxu1 %v496_v46 }
 0x159   :  { %499 = vmatpush3.bf16.msra.mxu1 %v496_v46 }
 0x15c   :  { %455 = vmatmul.mubr.msk.f32.vlgmr.msra.gmra.mrb[0].mxu1 %vm226_vm0, %v216_v47 }
 0x15d   :  { %457 = vmatprep.mubr.msk.f32.mxu1 %vm226_vm0, %v217_v48 }
 0x160   :  { %458 = vmatmul.mubr.msk.f32.gmra.mrb[2].mxu1 %vm226_vm0, %v218_v49 }
 0x22f   :  { %v456_v51 = vpop.f32.mrb[0].mxu1 }
 0x230   :  { %v311_v52 = vadd.f32 %v456_v51, %v375_v50  ;;  %v305_v53 = vpop.f32.mrb[1].mxu1 }
 0x231   :  { %v306_v54 = vadd.f32 %v375_v50, %v305_v53 }
 0x232   :  { %vm325_vm1 = vcmp.ge.f32.partialorder %v311_v52, 0.0  ;;  %v329_v55 = vmul.f32 0.01, %v311_v52 }
 0x233   :  { %vm324_vm2 = vcmp.ge.f32.partialorder %v306_v54, 0.0  ;;  %v328_v56 = vmul.f32 0.01, %v306_v54  ;;  %v459_v57 = vpop.f32.mrb[2].mxu1 }
 0x234   :  { %v321_v58 = vadd.f32 %v459_v57, %v375_v50  ;;  %v315_v59 = vpop.f32.mrb[3].mxu1  ;;  %v333_v60 = vsel %vm325_vm1, %v311_v52, %v329_v55 }
 0x235   :  { %v316_v61 = vadd.f32 %v375_v50, %v315_v59  ;;  %v332_v62 = vsel %vm324_vm2, %v306_v54, %v328_v56  ;;  %337 = vst [vmem:[#allocation11 + $0x8] sm:$0xff] %v333_v60 }
 0x236   :  { %vm327_vm3 = vcmp.ge.f32.partialorder %v321_v58, 0.0  ;;  %v331_v63 = vmul.f32 0.01, %v321_v58  ;;  %336 = vst [vmem:[#allocation11] sm:$0xff] %v332_v62 }
 0x237   :  { %vm326_vm4 = vcmp.ge.f32.partialorder %v316_v61, 0.0  ;;  %v330_v0 = vmul.f32 0.01, %v316_v61 }
 0x238   :  { %630 = shalt.err (!%p627_p2)
}
 0x239   :  { %s631_s0 = scalar_lea.hbm %s868_s7, 256 }
 0x23a   :  { %p632_p3 = scmp.ne.s32.totalorder %s868_s7, %s631_s0  ;;  %p635_p4 = scmp.lt.u32.totalorder %s631_s0, %s868_s7 }
 0x23c   :  { %p637_p5 = pnand %p635_p4, %p632_p3 }
 0x23e   :  { %640 = shalt.err (!%p637_p5)
}
 0x23f   :  { %351 = dma.vmem_to_hbm [thread:$0]  %s346_s26, 256, %s868_s7, [#allocation4], %s675_s17, %s675_s17, %s676_s18   ;;  %v335_v1 = vsel %vm327_vm3, %v321_v58, %v331_v63  ;;  %v334_v2 = vsel %vm326_vm4, %v316_v61, %v330_v0 }
 0x240   :  { %339 = vst [vmem:[#allocation12 + $0x8] sm:$0xff] %v335_v1  ;;  %338 = vst [vmem:[#allocation12] sm:$0xff] %v334_v2  ;;  %s641_s16 = scalar_lea.vmem %s358_s6, 256  ;;  %p646_p7 = scmp.lt.s32.totalorder %s358_s6, %s358_s6 }
 0x241   :  { %p642_p6 = scmp.ne.s32.totalorder %s358_s6, %s641_s16  ;;  %p647_p8 = scmp.lt.s32.totalorder %s641_s16, %s641_s16 }
 0x243   :  { %p648_p9 = por %p647_p8, %p646_p7 }
 0x245   :  { %p649_p10 = pnand %p648_p9, %p642_p6 }
 0x247   :  { %652 = shalt.err (!%p649_p10)
}
 0x248   :  { %s653_s21 = scalar_lea.hbm %s869_s8, 256 }
 0x249   :  { %p654_p11 = scmp.ne.s32.totalorder %s869_s8, %s653_s21  ;;  %p657_p12 = scmp.lt.u32.totalorder %s653_s21, %s869_s8 }
 0x24b   :  { %p659_p13 = pnand %p657_p12, %p654_p11 }
 0x24d   :  { %662 = shalt.err (!%p659_p13)
}
 0x24e   :  { %363 = dma.vmem_to_hbm [thread:$0]  %s358_s6, 256, %s869_s8, [#allocation13], %s675_s17, %s675_s17, %s676_s18  }
 0x24f   :  { %669 = dma.done.wait [#allocation4], 256  }
 0x250   :  { %670 = vsyncadd [#allocation4], 4294967040 }
 0x251   :  { %671 = dma.done.wait [#allocation13], 256  }
 0x252   :  { %672 = vsyncadd [#allocation13], 4294967040 }
 0x253   :  { %370 = vsyncpa [#allocation3], 1 }
 0x254   :  { %371 = vsyncpa [#allocation6], 1 }
 0x255   :  { %372 = vsyncpa [#allocation9], 1 }
 0x256   :  { %373 = vsyncpa [#allocation4], 1 }
 0x257   :  { %374 = vsyncpa [#allocation13], 1 }

</bundles_post_ra>
